<compile_context>
chip_gen: v6e
topology: v6e:2x2x1
jax: 0.10.0
libtpu: 0.0.40
codegen_flags: <defaults>
</compile_context>

<pallas_src>
import numpy as np
import jax
import jax.numpy as jnp
from jax.experimental import pallas as pl
from jax.experimental.pallas import tpu as pltpu

_EPS = 1e-5


def _resblock_kernel(x_ref, m1_ref, t1_ref, m2_ref, t2_ref, o_ref,
                     xs_ref, ms_ref):
    """One grid step processes one batch element.

    x_ref : (1, H, WC)   input image, channels-last flattened into lanes (WC = W*C)
    m1_ref: (3, WC, WC)  conv1 banded weights (one per kernel row), BN1 scale folded
    t1_ref: (1, WC)      BN1 bias (conv1 bias folded), tiled over w
    m2_ref: (3, WC, WC)  conv2 banded weights, BN2 scale folded
    t2_ref: (1, WC)      BN2 bias (conv2 bias folded), tiled over w
    o_ref : (1, H, WC)   output (lane-dense)
    xs_ref: (H+2, WC)    scratch: height-padded input
    ms_ref: (H+2, WC)    scratch: height-padded intermediate (post conv1/BN/ReLU)
    """
    H = o_ref.shape[1]
    WC = o_ref.shape[2]

    # Zero only the halo rows (the interiors are fully overwritten below).
    zero_row = jnp.zeros((1, WC), dtype=xs_ref.dtype)
    xs_ref[0:1, :] = zero_row
    xs_ref[H + 1:H + 2, :] = zero_row
    ms_ref[0:1, :] = zero_row
    ms_ref[H + 1:H + 2, :] = zero_row

    x = x_ref[0]                       # (H, WC), compute dtype
    xs_ref[1:H + 1, :] = x             # in-kernel height padding

    def conv3x3(src_ref, m_ref):
        # 3 MXU matmuls (H, WC) x (WC, WC), f32 accumulation.
        acc = jnp.dot(src_ref[0:H, :], m_ref[0],
                      preferred_element_type=jnp.float32)
        acc = acc + jnp.dot(src_ref[1:H + 1, :], m_ref[1],
                            preferred_element_type=jnp.float32)
        acc = acc + jnp.dot(src_ref[2:H + 2, :], m_ref[2],
                            preferred_element_type=jnp.float32)
        return acc                      # (H, WC) float32

    # conv1 -> BN1 (folded affine) -> ReLU
    out1 = jnp.maximum(conv3x3(xs_ref, m1_ref) + t1_ref[...], 0.0)
    ms_ref[1:H + 1, :] = out1.astype(ms_ref.dtype)

    # conv2 -> BN2 (folded affine) -> +residual -> ReLU
    out2 = conv3x3(ms_ref, m2_ref) + t2_ref[...] + x.astype(jnp.float32)
    o_ref[0] = jnp.maximum(out2, 0.0).astype(o_ref.dtype)


def _fold_conv_bn(w_hwio, b, gamma, beta, rmean, rvar, width):
    """Fold conv bias + eval-mode BatchNorm into banded matmul weights.

    Returns:
      M: (3, W*C, W*C) block-banded matrices (one per kernel row kh), with the
         BN scale folded into the output channels.  Width zero-padding of the
         'same' conv is encoded by the band structure (out-of-range taps are
         simply absent).
      t: (1, W*C) per-lane bias = ((b - running_mean) * scale + beta), tiled
         over the W positions.
    """
    C = w_hwio.shape[2]
    s = gamma / jnp.sqrt(rvar + _EPS)                 # (C,)
    t = (b - rmean) * s + beta                        # (C,)
    ws = w_hwio * s[None, None, None, :]              # fold scale into out-chans
    mats = []
    for kh in range(3):
        m = jnp.zeros((width * C, width * C), ws.dtype)
        for kw in range(3):
            d = kw - 1                                # source column w' = w + d
            band = jnp.eye(width, k=-d, dtype=ws.dtype)   # band[w', w] = (w' == w+d)
            m = m + jnp.kron(band, ws[kh, kw])        # place (C,C) blocks on band
        mats.append(m)
    return jnp.stack(mats, axis=0), jnp.tile(t, width).reshape(1, width * C)


def setup_residual_block_nhwc(x_nhwc, params, *, compute_dtype=jnp.float32):
    """Fused residual block on NHWC input (no layout transposes)."""
    N, H, W, C = x_nhwc.shape
    WC = W * C

    m1, t1 = _fold_conv_bn(params["w1"], params["b1"], params["g1"],
                           params["be1"], params["rm1"], params["rv1"], W)
    m2, t2 = _fold_conv_bn(params["w2"], params["b2"], params["g2"],
                           params["be2"], params["rm2"], params["rv2"], W)

    x2d = x_nhwc.reshape(N, H, WC).astype(compute_dtype)   # lane-dense view
    m1 = m1.astype(compute_dtype)
    m2 = m2.astype(compute_dtype)
    t1 = t1.astype(jnp.float32)
    t2 = t2.astype(jnp.float32)

    out2d = pl.pallas_call(
        _resblock_kernel,
        out_shape=jax.ShapeDtypeStruct((N, H, WC), jnp.float32),
        grid_spec=pltpu.PrefetchScalarGridSpec(
            num_scalar_prefetch=0,
            grid=(N,),
            in_specs=[
                pl.BlockSpec((1, H, WC), lambda n: (n, 0, 0)),
                pl.BlockSpec((3, WC, WC), lambda n: (0, 0, 0)),
                pl.BlockSpec((1, WC), lambda n: (0, 0)),
                pl.BlockSpec((3, WC, WC), lambda n: (0, 0, 0)),
                pl.BlockSpec((1, WC), lambda n: (0, 0)),
            ],
            out_specs=pl.BlockSpec((1, H, WC), lambda n: (n, 0, 0)),
            scratch_shapes=[pltpu.VMEM((H + 2, WC), compute_dtype),
                            pltpu.VMEM((H + 2, WC), compute_dtype)],
        ),
        compiler_params=pltpu.CompilerParams(
            dimension_semantics=("parallel",)),
    )(x2d, m1, t1, m2, t2)

    return out2d.reshape(N, H, W, C)


def setup_residual_block(x_nchw, params, *, compute_dtype=jnp.float32):
    """PyTorch-semantics forward of SetupResidualBlock (NCHW in/out, eval BN)."""
    x = jnp.transpose(x_nchw, (0, 2, 3, 1)).astype(jnp.float32)  # NHWC
    out = setup_residual_block_nhwc(x, params, compute_dtype=compute_dtype)
    return jnp.transpose(out, (0, 3, 1, 2))  # back to NCHW


def setup_residual_block_ref(x_nchw, params):
    """Pure-JAX reference (same semantics) for correctness checking."""
    x = jnp.transpose(x_nchw, (0, 2, 3, 1)).astype(jnp.float32)

    def conv(z, w, b):
        y = jax.lax.conv_general_dilated(
            z, w, window_strides=(1, 1), padding="SAME",
            dimension_numbers=("NHWC", "HWIO", "NHWC"))
        return y + b

    def bn(z, gamma, beta, rmean, rvar):
        return (z - rmean) / jnp.sqrt(rvar + _EPS) * gamma + beta

    out = jax.nn.relu(bn(conv(x, params["w1"], params["b1"]),
                         params["g1"], params["be1"],
                         params["rm1"], params["rv1"]))
    out = bn(conv(out, params["w2"], params["b2"]),
             params["g2"], params["be2"], params["rm2"], params["rv2"])
    out = jax.nn.relu(out + x)
    return jnp.transpose(out, (0, 3, 1, 2))


def make_params(key, C):
    ks = jax.random.split(key, 12)
    p = {}
    p["w1"] = 0.1 * jax.random.normal(ks[0], (3, 3, C, C), jnp.float32)
    p["b1"] = 0.1 * jax.random.normal(ks[1], (C,), jnp.float32)
    p["g1"] = 1.0 + 0.1 * jax.random.normal(ks[2], (C,), jnp.float32)
    p["be1"] = 0.1 * jax.random.normal(ks[3], (C,), jnp.float32)
    p["rm1"] = 0.1 * jax.random.normal(ks[4], (C,), jnp.float32)
    p["rv1"] = 0.5 + jnp.abs(jax.random.normal(ks[5], (C,), jnp.float32))
    p["w2"] = 0.1 * jax.random.normal(ks[6], (3, 3, C, C), jnp.float32)
    p["b2"] = 0.1 * jax.random.normal(ks[7], (C,), jnp.float32)
    p["g2"] = 1.0 + 0.1 * jax.random.normal(ks[8], (C,), jnp.float32)
    p["be2"] = 0.1 * jax.random.normal(ks[9], (C,), jnp.float32)
    p["rm2"] = 0.1 * jax.random.normal(ks[10], (C,), jnp.float32)
    p["rv2"] = 0.5 + jnp.abs(jax.random.normal(ks[11], (C,), jnp.float32))
    return p


if __name__ == "__main__":
    N, C, H, W = 2, 8, 16, 16            # W * C = 128 -> exactly one lane row
    key = jax.random.PRNGKey(0)
    k_x, k_p = jax.random.split(key)
    x = jax.random.normal(k_x, (N, C, H, W), jnp.float32)  # PyTorch NCHW
    params = make_params(k_p, C)

    ref = jax.block_until_ready(setup_residual_block_ref(x, params))

    # f32 matmul path: tight check against the XLA reference.
    out_f32 = jax.block_until_ready(setup_residual_block(x, params))
    np.testing.assert_allclose(np.asarray(out_f32), np.asarray(ref),
                               rtol=1e-4, atol=1e-4)
    assert out_f32.shape == (N, C, H, W)

    # bf16 matmul path (activations + folded weights bf16, f32 accumulate and
    # epilogue): ~2-4x MXU throughput on v6e/v7x and half the activation DMA
    # bytes; checked at a looser tolerance appropriate for bf16 inputs.
    out_bf16 = jax.block_until_ready(
        setup_residual_block(x, params, compute_dtype=jnp.bfloat16))
    np.testing.assert_allclose(np.asarray(out_bf16), np.asarray(ref),
                               rtol=5e-2, atol=5e-2)

    print("KERNEL_OK")
</pallas_src>

<mosaic_0001>
module attributes {stable_mosaic.version = 11 : i64} {
  func.func @_resblock_kernel(%arg0: i32, %arg1: memref<1x16x128xf32, #tpu.memory_space<vmem>>, %arg2: memref<3x128x128xf32, #tpu.memory_space<vmem>>, %arg3: memref<1x128xf32, #tpu.memory_space<vmem>>, %arg4: memref<3x128x128xf32, #tpu.memory_space<vmem>>, %arg5: memref<1x128xf32, #tpu.memory_space<vmem>>, %arg6: memref<1x16x128xf32, #tpu.memory_space<vmem>>, %arg7: memref<18x128xf32, #tpu.memory_space<vmem>>, %arg8: memref<18x128xf32, #tpu.memory_space<vmem>>) attributes {dimension_semantics = [#tpu.dimension_semantics<parallel>], iteration_bounds = array<i64: 2>, scalar_prefetch = 0 : i64, scratch_operands = 2 : i64, tpu.core_type = #tpu.core_type<tc>, window_params = [{transform_indices = @transform_0, window_bounds = array<i64: 1, 16, 128>}, {pipeline_mode = #tpu.pipeline_mode<synchronous>, transform_indices = @transform_1, window_bounds = array<i64: 3, 128, 128>}, {pipeline_mode = #tpu.pipeline_mode<synchronous>, transform_indices = @transform_2, window_bounds = array<i64: 1, 128>}, {pipeline_mode = #tpu.pipeline_mode<synchronous>, transform_indices = @transform_3, window_bounds = array<i64: 3, 128, 128>}, {pipeline_mode = #tpu.pipeline_mode<synchronous>, transform_indices = @transform_4, window_bounds = array<i64: 1, 128>}, {transform_indices = @transform_5, window_bounds = array<i64: 1, 16, 128>}]} {
    %cst = arith.constant 0.000000e+00 : f32
    %0 = vector.broadcast %cst : f32 to vector<1x128xf32>
    %c0 = arith.constant 0 : index
    %c0_0 = arith.constant 0 : index
    %1 = vector.load %arg7[%c0, %c0_0] : memref<18x128xf32, #tpu.memory_space<vmem>>, vector<1x128xf32>
    tpu.vector_store %arg7[%c0, %c0_0], %0 {strides = array<i32>} : memref<18x128xf32, #tpu.memory_space<vmem>>, vector<1x128xf32>,
    %c17 = arith.constant 17 : index
    %c0_1 = arith.constant 0 : index
    %2 = vector.load %arg7[%c17, %c0_1] : memref<18x128xf32, #tpu.memory_space<vmem>>, vector<1x128xf32>
    tpu.vector_store %arg7[%c17, %c0_1], %0 {strides = array<i32>} : memref<18x128xf32, #tpu.memory_space<vmem>>, vector<1x128xf32>,
    %c0_2 = arith.constant 0 : index
    %c0_3 = arith.constant 0 : index
    %3 = vector.load %arg8[%c0_2, %c0_3] : memref<18x128xf32, #tpu.memory_space<vmem>>, vector<1x128xf32>
    tpu.vector_store %arg8[%c0_2, %c0_3], %0 {strides = array<i32>} : memref<18x128xf32, #tpu.memory_space<vmem>>, vector<1x128xf32>,
    %c17_4 = arith.constant 17 : index
    %c0_5 = arith.constant 0 : index
    %4 = vector.load %arg8[%c17_4, %c0_5] : memref<18x128xf32, #tpu.memory_space<vmem>>, vector<1x128xf32>
    tpu.vector_store %arg8[%c17_4, %c0_5], %0 {strides = array<i32>} : memref<18x128xf32, #tpu.memory_space<vmem>>, vector<1x128xf32>,
    %c0_6 = arith.constant 0 : index
    %c0_7 = arith.constant 0 : index
    %c0_8 = arith.constant 0 : index
    %5 = vector.load %arg1[%c0_6, %c0_7, %c0_8] : memref<1x16x128xf32, #tpu.memory_space<vmem>>, vector<1x16x128xf32>
    %6 = vector.shape_cast %5 : vector<1x16x128xf32> to vector<16x128xf32>
    %c1 = arith.constant 1 : index
    %c0_9 = arith.constant 0 : index
    %7 = vector.load %arg7[%c1, %c0_9] : memref<18x128xf32, #tpu.memory_space<vmem>>, vector<16x128xf32>
    tpu.vector_store %arg7[%c1, %c0_9], %6 {strides = array<i32>} : memref<18x128xf32, #tpu.memory_space<vmem>>, vector<16x128xf32>,
    %c0_10 = arith.constant 0 : index
    %c0_11 = arith.constant 0 : index
    %8 = vector.load %arg7[%c0_10, %c0_11] : memref<18x128xf32, #tpu.memory_space<vmem>>, vector<16x128xf32>
    %c0_12 = arith.constant 0 : index
    %c0_13 = arith.constant 0 : index
    %c0_14 = arith.constant 0 : index
    %9 = vector.load %arg2[%c0_12, %c0_13, %c0_14] : memref<3x128x128xf32, #tpu.memory_space<vmem>>, vector<1x128x128xf32>
    %10 = vector.shape_cast %9 : vector<1x128x128xf32> to vector<128x128xf32>
    %cst_15 = arith.constant dense<0.000000e+00> : vector<16x128xf32>
    %11 = tpu.matmul %8, %10, %cst_15 {dimension_numbers = #tpu.dot_dimension_numbers<[1], [0], [0], [1], [0, 0, 1, 1], [], []>} : vector<16x128xf32>, vector<128x128xf32>, vector<16x128xf32> -> vector<16x128xf32>
    %c1_16 = arith.constant 1 : index
    %c0_17 = arith.constant 0 : index
    %12 = vector.load %arg7[%c1_16, %c0_17] : memref<18x128xf32, #tpu.memory_space<vmem>>, vector<16x128xf32>
    %c1_18 = arith.constant 1 : index
    %c0_19 = arith.constant 0 : index
    %c0_20 = arith.constant 0 : index
    %13 = vector.load %arg2[%c1_18, %c0_19, %c0_20] : memref<3x128x128xf32, #tpu.memory_space<vmem>>, vector<1x128x128xf32>
    %14 = vector.shape_cast %13 : vector<1x128x128xf32> to vector<128x128xf32>
    %cst_21 = arith.constant dense<0.000000e+00> : vector<16x128xf32>
    %15 = tpu.matmul %12, %14, %cst_21 {dimension_numbers = #tpu.dot_dimension_numbers<[1], [0], [0], [1], [0, 0, 1, 1], [], []>} : vector<16x128xf32>, vector<128x128xf32>, vector<16x128xf32> -> vector<16x128xf32>
    %16 = arith.addf %11, %15 : vector<16x128xf32>
    %c2 = arith.constant 2 : index
    %c0_22 = arith.constant 0 : index
    %17 = vector.load %arg7[%c2, %c0_22] : memref<18x128xf32, #tpu.memory_space<vmem>>, vector<16x128xf32>
    %c2_23 = arith.constant 2 : index
    %c0_24 = arith.constant 0 : index
    %c0_25 = arith.constant 0 : index
    %18 = vector.load %arg2[%c2_23, %c0_24, %c0_25] : memref<3x128x128xf32, #tpu.memory_space<vmem>>, vector<1x128x128xf32>
    %19 = vector.shape_cast %18 : vector<1x128x128xf32> to vector<128x128xf32>
    %cst_26 = arith.constant dense<0.000000e+00> : vector<16x128xf32>
    %20 = tpu.matmul %17, %19, %cst_26 {dimension_numbers = #tpu.dot_dimension_numbers<[1], [0], [0], [1], [0, 0, 1, 1], [], []>} : vector<16x128xf32>, vector<128x128xf32>, vector<16x128xf32> -> vector<16x128xf32>
    %21 = arith.addf %16, %20 : vector<16x128xf32>
    %c0_27 = arith.constant 0 : index
    %c0_28 = arith.constant 0 : index
    %22 = vector.load %arg3[%c0_27, %c0_28] : memref<1x128xf32, #tpu.memory_space<vmem>>, vector<1x128xf32>
    %23 = vector.broadcast %22 : vector<1x128xf32> to vector<16x128xf32>
    %24 = arith.addf %21, %23 : vector<16x128xf32>
    %cst_29 = arith.constant 0.000000e+00 : f32
    %25 = vector.broadcast %cst_29 : f32 to vector<16x128xf32>
    %26 = arith.maximumf %24, %25 : vector<16x128xf32>
    %c1_30 = arith.constant 1 : index
    %c0_31 = arith.constant 0 : index
    %27 = vector.load %arg8[%c1_30, %c0_31] : memref<18x128xf32, #tpu.memory_space<vmem>>, vector<16x128xf32>
    tpu.vector_store %arg8[%c1_30, %c0_31], %26 {strides = array<i32>} : memref<18x128xf32, #tpu.memory_space<vmem>>, vector<16x128xf32>,
    %c0_32 = arith.constant 0 : index
    %c0_33 = arith.constant 0 : index
    %28 = vector.load %arg8[%c0_32, %c0_33] : memref<18x128xf32, #tpu.memory_space<vmem>>, vector<16x128xf32>
    %c0_34 = arith.constant 0 : index
    %c0_35 = arith.constant 0 : index
    %c0_36 = arith.constant 0 : index
    %29 = vector.load %arg4[%c0_34, %c0_35, %c0_36] : memref<3x128x128xf32, #tpu.memory_space<vmem>>, vector<1x128x128xf32>
    %30 = vector.shape_cast %29 : vector<1x128x128xf32> to vector<128x128xf32>
    %cst_37 = arith.constant dense<0.000000e+00> : vector<16x128xf32>
    %31 = tpu.matmul %28, %30, %cst_37 {dimension_numbers = #tpu.dot_dimension_numbers<[1], [0], [0], [1], [0, 0, 1, 1], [], []>} : vector<16x128xf32>, vector<128x128xf32>, vector<16x128xf32> -> vector<16x128xf32>
    %c1_38 = arith.constant 1 : index
    %c0_39 = arith.constant 0 : index
    %32 = vector.load %arg8[%c1_38, %c0_39] : memref<18x128xf32, #tpu.memory_space<vmem>>, vector<16x128xf32>
    %c1_40 = arith.constant 1 : index
    %c0_41 = arith.constant 0 : index
    %c0_42 = arith.constant 0 : index
    %33 = vector.load %arg4[%c1_40, %c0_41, %c0_42] : memref<3x128x128xf32, #tpu.memory_space<vmem>>, vector<1x128x128xf32>
    %34 = vector.shape_cast %33 : vector<1x128x128xf32> to vector<128x128xf32>
    %cst_43 = arith.constant dense<0.000000e+00> : vector<16x128xf32>
    %35 = tpu.matmul %32, %34, %cst_43 {dimension_numbers = #tpu.dot_dimension_numbers<[1], [0], [0], [1], [0, 0, 1, 1], [], []>} : vector<16x128xf32>, vector<128x128xf32>, vector<16x128xf32> -> vector<16x128xf32>
    %36 = arith.addf %31, %35 : vector<16x128xf32>
    %c2_44 = arith.constant 2 : index
    %c0_45 = arith.constant 0 : index
    %37 = vector.load %arg8[%c2_44, %c0_45] : memref<18x128xf32, #tpu.memory_space<vmem>>, vector<16x128xf32>
    %c2_46 = arith.constant 2 : index
    %c0_47 = arith.constant 0 : index
    %c0_48 = arith.constant 0 : index
    %38 = vector.load %arg4[%c2_46, %c0_47, %c0_48] : memref<3x128x128xf32, #tpu.memory_space<vmem>>, vector<1x128x128xf32>
    %39 = vector.shape_cast %38 : vector<1x128x128xf32> to vector<128x128xf32>
    %cst_49 = arith.constant dense<0.000000e+00> : vector<16x128xf32>
    %40 = tpu.matmul %37, %39, %cst_49 {dimension_numbers = #tpu.dot_dimension_numbers<[1], [0], [0], [1], [0, 0, 1, 1], [], []>} : vector<16x128xf32>, vector<128x128xf32>, vector<16x128xf32> -> vector<16x128xf32>
    %41 = arith.addf %36, %40 : vector<16x128xf32>
    %c0_50 = arith.constant 0 : index
    %c0_51 = arith.constant 0 : index
    %42 = vector.load %arg5[%c0_50, %c0_51] : memref<1x128xf32, #tpu.memory_space<vmem>>, vector<1x128xf32>
    %43 = vector.broadcast %42 : vector<1x128xf32> to vector<16x128xf32>
    %44 = arith.addf %41, %43 : vector<16x128xf32>
    %45 = arith.addf %44, %6 : vector<16x128xf32>
    %cst_52 = arith.constant 0.000000e+00 : f32
    %46 = vector.broadcast %cst_52 : f32 to vector<16x128xf32>
    %47 = arith.maximumf %45, %46 : vector<16x128xf32>
    %c0_53 = arith.constant 0 : index
    %c0_54 = arith.constant 0 : index
    %c0_55 = arith.constant 0 : index
    %48 = vector.load %arg6[%c0_53, %c0_54, %c0_55] : memref<1x16x128xf32, #tpu.memory_space<vmem>>, vector<1x16x128xf32>
    %49 = vector.shape_cast %48 : vector<1x16x128xf32> to vector<16x128xf32>
    %50 = vector.shape_cast %47 : vector<16x128xf32> to vector<1x16x128xf32>
    tpu.vector_store %arg6[%c0_53, %c0_54, %c0_55], %50 {strides = array<i32>} : memref<1x16x128xf32, #tpu.memory_space<vmem>>, vector<1x16x128xf32>,
    return
  }
  func.func @transform_0(%arg0: i32) -> (i32, i32, i32) {
    %c0_i32 = arith.constant 0 : i32
    %c0_i32_0 = arith.constant 0 : i32
    %c0_i32_1 = arith.constant 0 : i32
    return %arg0, %c0_i32, %c0_i32_0 : i32, i32, i32
  }
  func.func @transform_1(%arg0: i32) -> (i32, i32, i32) {
    %c0_i32 = arith.constant 0 : i32
    %c0_i32_0 = arith.constant 0 : i32
    %c0_i32_1 = arith.constant 0 : i32
    %c0_i32_2 = arith.constant 0 : i32
    return %c0_i32, %c0_i32_0, %c0_i32_1 : i32, i32, i32
  }
  func.func @transform_2(%arg0: i32) -> (i32, i32) {
    %c0_i32 = arith.constant 0 : i32
    %c0_i32_0 = arith.constant 0 : i32
    %c0_i32_1 = arith.constant 0 : i32
    return %c0_i32, %c0_i32_0 : i32, i32
  }
  func.func @transform_3(%arg0: i32) -> (i32, i32, i32) {
    %c0_i32 = arith.constant 0 : i32
    %c0_i32_0 = arith.constant 0 : i32
    %c0_i32_1 = arith.constant 0 : i32
    %c0_i32_2 = arith.constant 0 : i32
    return %c0_i32, %c0_i32_0, %c0_i32_1 : i32, i32, i32
  }
  func.func @transform_4(%arg0: i32) -> (i32, i32) {
    %c0_i32 = arith.constant 0 : i32
    %c0_i32_0 = arith.constant 0 : i32
    %c0_i32_1 = arith.constant 0 : i32
    return %c0_i32, %c0_i32_0 : i32, i32
  }
  func.func @transform_5(%arg0: i32) -> (i32, i32, i32) {
    %c0_i32 = arith.constant 0 : i32
    %c0_i32_0 = arith.constant 0 : i32
    %c0_i32_1 = arith.constant 0 : i32
    return %arg0, %c0_i32, %c0_i32_0 : i32, i32, i32
  }
}

</mosaic_0001>

<bundles_post_ra>
// kernel: tpu_custom_call.1
= control target key start
LH: loop header
LB: loop body
LE: loop exit
PB: predicated region body
PF: predicated region fallthrough
CT: control target
= control target key end

     0   :  { %10 = vsyncpa [#allocation5], 0  ;;  %s1802_s0 = inlined_call_operand.hbm [shape: f32[2,16,128], index: 0, kind: input, shape index: {}]   ;;  %s1803_s1 = inlined_call_operand.hbm [shape: f32[3,128,128], index: 1, kind: input, shape index: {}]   ;;  %s1804_s2 = inlined_call_operand.vmem [shape: f32[1,128], index: 2, kind: input, shape index: {}]   ;;  %s1805_s3 = inlined_call_operand.hbm [shape: f32[3,128,128], index: 3, kind: input, shape index: {}]   ;;  %s1806_s4 = inlined_call_operand.vmem [shape: f32[1,128], index: 4, kind: input, shape index: {}]   ;;  %s1807_s5 = inlined_call_operand.hbm [shape: f32[2,16,128], index: 5, kind: output, shape index: {}]  }
   0x1   :  { %12 = vsyncpa [#allocation5 + $0x1], 0 }
   0x2   :  { %13 = vsyncpa [#allocation8], 0 }
   0x3   :  { %14 = vsyncpa [#allocation6], 0 }
   0x4   :  { %16 = vsyncpa [#allocation6 + $0x1], 0  ;;  %s1581_s18 = smov 0   ;;  %s1583_s19 = smov 0  }
   0x5   :  { %s1585_s20 = smov 0   ;;  %s1587_s21 = smov 0  }
   0x6 LB: > { %s1602_s22 = sadd.s32 4294967295, %s1540_s21   ;;  %s980_s23 = sadd.s32 4294967294, %s1540_s21   ;;  %s1540_s21 = sphi %s1587_s21, %s1830_s21   ;;  %s1536_s20 = sphi %s1585_s20, %s1829_s20   ;;  %s1532_s19 = sphi %s1583_s19, %s1828_s19   ;;  %s1528_s18 = sphi %s1581_s18, %s1827_s18  }
   0x7   : > { %p42_p0 = scmp.ne.s32.totalorder %s1532_s19, %s1528_s18  ;;  %p1808_p1 = scmp.eq.s32.totalorder %s1602_s22, 0 }
   0x8   : > { %p150_p2 = scmp.eq.s32.totalorder %s1602_s22, 1  ;;  %p156_p3 = scmp.eq.s32.totalorder %s980_s23, 1 }
   0x9   : > { %p1611_p4 = por %p1808_p1, %p42_p0  ;;  %p981_p5 = scmp.ge.s32.totalorder %s1540_s21, 1 }
   0xa   : > { %p1616_p6 = por %p156_p3, %p42_p0  ;;  %p163_p7 = scmp.lt.s32.totalorder %s1540_s21, 3 }
   0xb   : > { %s1813_s24 = scalar_select %p1611_p4, 1, 0 }
   0xc   : > { %s1814_s25 = scalar_select %p1616_p6, 1, 0 }
   0xd   : > { %p1621_p8 = pnand %p981_p5, %p163_p7  ;;  %s1542_s27 = smov [#allocation7]  }
   0xe   : > { %s175_s28 = sshll.u32 %s1542_s27, 4  ;;  %s1543_s30 = smov [#allocation9]   ;;  %s176_s28 = int_to_ptr.vmem [resolvable:$true] %s175_s28 }
   0xf   : > { %s1815_s26 = scalar_select %p1621_p8, 1, 0 }
  0x10   : > { %p1332_p9 = pneg %p1621_p8  ;;  %s191_s6 = sshll.u32 %s1543_s30, 4  ;;  %s192_s6 = int_to_ptr.vmem [resolvable:$true] %s191_s6 }
  0x11   : > { %s1403_s7 = scalar_lea.vmem %s176_s28, 6144  ;;  %p1411_p5 = scmp.lt.s32.totalorder %s176_s28, %s176_s28 }
  0x12   : > { %p1630_p11 = pnand %p1332_p9, %p1808_p1  ;;  %p1404_p13 = scmp.ne.s32.totalorder %s176_s28, %s1403_s7 }
  0x13   : > { %p1412_p7 = scmp.lt.s32.totalorder %s1403_s7, %s1403_s7 }
  0x14   : > { %p1394_p12 = pneg %p1630_p11 }
  0x15   : > { %p1413_p10 = por %p1412_p7, %p1411_p5 }
  0x16   : > { %p1406_p0 = pnand %p1404_p13, %p1394_p12 }
  0x18   : > { %p1407_p3 = pneg %p1406_p0 }
  0x1a   : > { %p1414_p9 = pnand %p1413_p10, %p1407_p3 }
  0x1c   : > { %1417 = shalt.err (!%p1414_p9)
}
  0x1d   : > { %s1809_s8 = smov 128   ;;  %s1545_s9 = smov 8  }
  0x1e   : > { %1335 = dma.hbm_to_vmem [thread:$0]  (!%p1630_p11), %s1803_s1, 6144, %s176_s28, [#allocation8], %s1809_s8, %s1809_s8, %s1545_s9  }
  0x1f   : > { %s1429_s12 = scalar_lea.vmem %s192_s6, 6144  ;;  %p1437_p10 = scmp.lt.s32.totalorder %s192_s6, %s192_s6 }
  0x20   : > { %p1430_p13 = scmp.ne.s32.totalorder %s192_s6, %s1429_s12  ;;  %p1438_p3 = scmp.lt.s32.totalorder %s1429_s12, %s1429_s12 }
  0x22   : > { %p1432_p0 = pnand %p1430_p13, %p1394_p12  ;;  %p1439_p7 = por %p1438_p3, %p1437_p10 }
  0x24   : > { %p1433_p5 = pneg %p1432_p0 }
  0x26   : > { %p1440_p9 = pnand %p1439_p7, %p1433_p5 }
  0x28   : > { %1443 = shalt.err (!%p1440_p9)
}
  0x29   : > { %1338 = dma.hbm_to_vmem [thread:$0]  (!%p1630_p11), %s1805_s3, 6144, %s192_s6, [#allocation8], %s1809_s8, %s1809_s8, %s1545_s9  }
  0x2a   : > { %s1659_s15 = sadd.s32 1, %s1540_s21   ;;  %s29_s16 = sadd.s32 1, %s1536_s20 }
  0x2b   : > { %s26_s17 = ssub.s32 %s1540_s21, %s1659_s15  ;;  %p36_p12 = scmp.ne.s32.totalorder %s1536_s20, %s1532_s19 }
  0x2c   : > { %p27_p13 = scmp.eq.s32.totalorder %s26_s17, 0  ;;  %p37_p0 = scmp.eq.s32.totalorder %s1540_s21, 0 }
  0x2d   : > { %p1669_p5 = por %p150_p2, %p36_p12  ;;  %p1349_p10 = scmp.lt.s32.totalorder %s1540_s21, 2 }
  0x2e   : > { %s1675_s27 = scalar_select %p27_p13, %s1536_s20, %s29_s16  }
  0x2f   : > { %s1817_s23 = scalar_select %p1669_p5, 1, 0 }
  0x30   : > { %p38_p3 = por %p37_p0, %p36_p12  ;;  %s208_s28 = sand.u32 1, %s1536_s20  }
  0x31   : > { %s985_s29 = sshll.u32 %s208_s28, 4  ;;  %s1000_s30 = sshll.u32 %s1540_s21, 8 }
  0x32   : > { %s1682_s10 = scalar_lea.hbm %s1802_s0, %s1000_s30  ;;  %s212_s11 = scalar_lea.vmem [#allocation4], %s985_s29 }
  0x33   : > { %s219_s12 = sshll.u32 %s212_s11, 4  ;;  %p1686_p2 = pnand %p1349_p10, %p38_p3  ;;  %s1684_s12 = int_to_ptr.vmem [resolvable:$true] %s219_s12 }
  0x34   : > { %s1690_s14 = scalar_lea.sflag [#allocation5], %s208_s28  ;;  %s1444_s16 = scalar_lea.hbm %s1682_s10, 256 }
  0x35   : > { %p1445_p11 = scmp.ne.s32.totalorder %s1682_s10, %s1444_s16  ;;  %p1446_p7 = pneg %p1686_p2 }
  0x36   : > { %s1449_s29 = scalar_lea.hbm %s1802_s0, 512  ;;  %p1450_p13 = scmp.lt.s32.totalorder %s1682_s10, %s1802_s0 }
  0x37   : > { %p1447_p9 = pnand %p1446_p7, %p1445_p11  ;;  %p1451_p0 = scmp.lt.s32.totalorder %s1449_s29, %s1444_s16 }
  0x39   : > { %p1448_p12 = pneg %p1447_p9  ;;  %p1452_p10 = por %p1451_p0, %p1450_p13 }
  0x3b   : > { %p1453_p3 = pnand %p1452_p10, %p1448_p12 }
  0x3d   : > { %1456 = shalt.err (!%p1453_p3)
}
  0x3e   : > { %s1457_s28 = scalar_lea.vmem %s1684_s12, 256  ;;  %s1546_s11 = smov [#allocation4]  }
  0x3f   : > { %p1458_p1 = scmp.ne.s32.totalorder %s1684_s12, %s1457_s28  ;;  %s1462_s8 = sshll.u32 %s1546_s11, 4  ;;  %s1463_s8 = int_to_ptr.vmem [resolvable:$false] %s1462_s8 }
  0x40   : > { %s1464_s17 = scalar_lea.vmem %s1463_s8, 512  ;;  %p1465_p9 = scmp.lt.s32.totalorder %s1684_s12, %s1463_s8 }
  0x41   : > { %p1460_p6 = pnand %p1458_p1, %p1446_p7  ;;  %p1466_p5 = scmp.lt.s32.totalorder %s1464_s17, %s1457_s28 }
  0x43   : > { %p1461_p11 = pneg %p1460_p6  ;;  %p1467_p4 = por %p1466_p5, %p1465_p9 }
  0x45   : > { %p1468_p8 = pnand %p1467_p4, %p1461_p11 }
  0x47   : > { %1471 = shalt.err (!%p1468_p8)
}
  0x48   : > { %s1819_s16 = smov 128   ;;  %p1820_p1 = scmp.ne.s32.totalorder %s1815_s26, 0 }
  0x49   : > { %1342 = dma.hbm_to_vmem [thread:$0]  (!%p1686_p2), %s1682_s10, 256, %s1684_s12, %s1690_s14, %s1819_s16, %s1819_s16, %s1545_s9  }
  0x4a   : > { %231 = sbr.rel (%p1820_p1) target bundleno = 602 (0x25a), region = 40  ;;  %s1717_s30 = sand.u32 (!%p1820_p1), 1, %s1532_s19  }
  0x4b   : > { %s989_s8 = sshll.u32 (!%p1820_p1), %s1717_s30, 4  ;;  %s234_s29 = scalar_lea.sflag (!%p1820_p1), [#allocation5], %s1717_s30 }
  0x4c   : > { %s1723_s13 = scalar_lea.vmem (!%p1820_p1), [#allocation4], %s989_s8  ;;  %p1821_p4 = scmp.ne.s32.totalorder (!%p1820_p1), %s1813_s24, 0 }
  0x4f   : > { %1515 = dma.done.wait (%p1821_p4), %s234_s29, 256  }
  0x50   : > { %1517 = vsyncadd (%p1821_p4), %s234_s29, 4294967040  ;;  %p1822_p6 = scmp.eq.s32.totalorder %s1602_s22, 0 }
  0x52   : > { %1519 = dma.done.wait (%p1822_p6), [#allocation8], 12288   ;;  %p1823_p8 = pmov %p1822_p6 }
  0x53   : > { %v1547_v0 = vmov 0.0   ;;  %v316_v1 = vld [vmem:[#allocation7 + $0xf8] sm:$0xff]  ;;  %v315_v3 = vld [vmem:[#allocation7 + $0xf0] sm:$0xff]  ;;  %v314_v5 = vld [vmem:[#allocation7 + $0xe8] sm:$0xff]  ;;  %s271_s12 = scalar_lea.vmem [#allocation10], %s989_s8  ;;  %s1001_s6 = sshll.u32 %s1602_s22, 8 }
  0x54   : > { %1521 = vsyncadd (%p1823_p8), [#allocation8], 4294955008  ;;  %272 = vst [vmem:[#allocation2] sm:$0x1] %v1547_v0  ;;  %v297_v2 = vld [vmem:[#allocation7 + $0x78] sm:$0xff]  ;;  %1110 = vmatprep.subr.mxu0 %v316_v1  ;;  %v296_v4 = vld [vmem:[#allocation7 + $0x70] sm:$0xff]  ;;  %s1759_s11 = scalar_lea.hbm %s1807_s5, %s1001_s6 }
  0x55   : > { %273 = vst [vmem:[#allocation2 + $0x11] sm:$0x1] %v1547_v0  ;;  %274 = vst [vmem:[#allocation3] sm:$0x1] %v1547_v0  ;;  %1145 = vmatprep.subr.mxu1 %v297_v2  ;;  %1111 = vmatpush3.msra.mxu0 %v316_v1  ;;  %v295_v6 = vld [vmem:[#allocation7 + $0x68] sm:$0xff]  ;;  %v313_v7 = vld [vmem:[#allocation7 + $0xe0] sm:$0xff] }
  0x56   : > { %275 = vst [vmem:[#allocation3 + $0x11] sm:$0x1] %v1547_v0  ;;  %1146 = vmatpush3.msra.mxu1 %v297_v2  ;;  %1112 = vmatprep.subr.mxu0 %v315_v3  ;;  %v294_v8 = vld [vmem:[#allocation7 + $0x60] sm:$0xff]  ;;  %v312_v9 = vld [vmem:[#allocation7 + $0xd8] sm:$0xff]  ;;  %v311_v11 = vld [vmem:[#allocation7 + $0xd0] sm:$0xff]  ;;  %s888_s14 = sshll.u32 %s271_s12, 4  ;;  %s1753_s14 = int_to_ptr.vmem [resolvable:$true] %s888_s14 }
  0x57   : > { %1147 = vmatprep.subr.mxu1 %v296_v4  ;;  %1113 = vmatpush3.msra.mxu0 %v315_v3  ;;  %v293_v10 = vld [vmem:[#allocation7 + $0x58] sm:$0xff]  ;;  %v292_v12 = vld [vmem:[#allocation7 + $0x50] sm:$0xff]  ;;  %v310_v13 = vld [vmem:[#allocation7 + $0xc8] sm:$0xff]  ;;  %s875_s17 = scalar_lea.sflag [#allocation6], %s1717_s30  ;;  %s1472_s16 = scalar_lea.vmem %s1753_s14, 256 }
  0x58   : > { %1148 = vmatpush3.msra.mxu1 %v296_v4  ;;  %1114 = vmatprep.subr.mxu0 %v314_v5  ;;  %v291_v14 = vld [vmem:[#allocation7 + $0x48] sm:$0xff]  ;;  %v1734_v15 = vld [vmem:[%s1723_s13] sm:$0xff]  ;;  %v308_v19 = vld [vmem:[#allocation7 + $0xb8] sm:$0xff]  ;;  %p1473_p5 = scmp.ne.s32.totalorder %s1753_s14, %s1472_s16  ;;  %p1824_p2 = scmp.ne.s32.totalorder %s1817_s23, 0 }
  0x59   : > { %1149 = vmatprep.subr.mxu1 %v295_v6  ;;  %1115 = vmatpush3.msra.mxu0 %v314_v5  ;;  %278 = vst [vmem:[#allocation2 + $0x1] sm:$0xff] %v1734_v15  ;;  %v1738_v16 = vld [vmem:[%s1723_s13 + $0x8] sm:$0xff]  ;;  %v309_v17 = vld [vmem:[#allocation7 + $0xc0] sm:$0xff]  ;;  %v307_v21 = vld [vmem:[#allocation7 + $0xb0] sm:$0xff]  ;;  %s1548_s22 = smov [#allocation10]  }
  0x5a   : > { %1150 = vmatpush3.msra.mxu1 %v295_v6  ;;  %1116 = vmatprep.subr.mxu0 %v313_v7  ;;  %v290_v18 = vld [vmem:[#allocation7 + $0x40] sm:$0xff]  ;;  %279 = vst [vmem:[#allocation2 + $0x9] sm:$0xff] %v1738_v16  ;;  %v289_v20 = vld [vmem:[#allocation7 + $0x38] sm:$0xff]  ;;  %v288_v22 = vld [vmem:[#allocation7 + $0x30] sm:$0xff]  ;;  %p1474_p7 = pnand %p1473_p5, %p1824_p2  ;;  %s1476_s8 = sshll.u32 %s1548_s22, 4  ;;  %s1477_s8 = int_to_ptr.vmem [resolvable:$false] %s1476_s8 }
  0x5b   : > { %1151 = vmatprep.subr.mxu1 %v294_v8  ;;  %1117 = vmatpush3.msra.mxu0 %v313_v7  ;;  %v306_v23 = vld [vmem:[#allocation7 + $0xa8] sm:$0xff]  ;;  %v305_v25 = vld [vmem:[#allocation7 + $0xa0] sm:$0xff]  ;;  %v304_v27 = vld [vmem:[#allocation7 + $0x98] sm:$0xff]  ;;  %s1478_s29 = scalar_lea.vmem %s1477_s8, 512  ;;  %p1479_p13 = scmp.lt.s32.totalorder %s1753_s14, %s1477_s8 }
  0x5c   : > { %1152 = vmatpush3.msra.mxu1 %v294_v8  ;;  %1118 = vmatprep.subr.mxu0 %v312_v9  ;;  %v287_v24 = vld [vmem:[#allocation7 + $0x28] sm:$0xff]  ;;  %v286_v26 = vld [vmem:[#allocation7 + $0x20] sm:$0xff]  ;;  %v285_v28 = vld [vmem:[#allocation7 + $0x18] sm:$0xff]  ;;  %p1475_p12 = pneg %p1474_p7  ;;  %p1480_p0 = scmp.lt.s32.totalorder %s1478_s29, %s1472_s16 }
  0x5d   : > { %1153 = vmatprep.subr.mxu1 %v293_v10  ;;  %1119 = vmatpush3.msra.mxu0 %v312_v9  ;;  %v303_v29 = vld [vmem:[#allocation7 + $0x90] sm:$0xff]  ;;  %v302_v31 = vld [vmem:[#allocation7 + $0x88] sm:$0xff]  ;;  %v301_v33 = vld [vmem:[#allocation7 + $0x80] sm:$0xff] }
  0x5e   : > { %1154 = vmatpush3.msra.mxu1 %v293_v10  ;;  %1120 = vmatprep.subr.mxu0 %v311_v11  ;;  %v284_v30 = vld [vmem:[#allocation7 + $0x10] sm:$0xff]  ;;  %v283_v32 = vld [vmem:[#allocation7 + $0x8] sm:$0xff]  ;;  %v282_v34 = vld [vmem:[#allocation7] sm:$0xff]  ;;  %p1481_p10 = por %p1480_p0, %p1479_p13 }
  0x5f   : > { %1155 = vmatprep.subr.mxu1 %v292_v12  ;;  %1121 = vmatpush3.msra.mxu0 %v311_v11  ;;  %v485_v37 = vld [vmem:[#allocation7 + $0x178] sm:$0xff]  ;;  %v484_v39 = vld [vmem:[#allocation7 + $0x170] sm:$0xff]  ;;  %v483_v40 = vld [vmem:[#allocation7 + $0x168] sm:$0xff] }
  0x60   : > { %1156 = vmatpush3.msra.mxu1 %v292_v12  ;;  %1122 = vmatprep.subr.mxu0 %v310_v13  ;;  %v280_v35 = vld [vmem:[#allocation2] sm:$0xff]  ;;  %v482_v41 = vld [vmem:[#allocation7 + $0x160] sm:$0xff]  ;;  %v481_v42 = vld [vmem:[#allocation7 + $0x158] sm:$0xff]  ;;  %p1482_p3 = pnand %p1481_p10, %p1475_p12 }
  0x61   : > { %1157 = vmatprep.subr.mxu1 %v291_v14  ;;  %1123 = vmatpush3.msra.mxu0 %v310_v13  ;;  %v281_v36 = vld [vmem:[#allocation2 + $0x8] sm:$0xff]  ;;  %v480_v43 = vld [vmem:[#allocation7 + $0x150] sm:$0xff]  ;;  %v479_v44 = vld [vmem:[#allocation7 + $0x148] sm:$0xff] }
  0x62   : > { %1158 = vmatpush3.msra.mxu1 %v291_v14  ;;  %1124 = vmatprep.subr.mxu0 %v309_v17  ;;  %v467_v38 = vld [vmem:[#allocation2 + $0x2] sm:$0xff]  ;;  %v478_v45 = vld [vmem:[#allocation7 + $0x140] sm:$0xff]  ;;  %v475_v48 = vld [vmem:[#allocation7 + $0x128] sm:$0xff] }
  0x63   : > { %1159 = vmatprep.subr.mxu1 %v290_v18  ;;  %1125 = vmatpush3.msra.mxu0 %v309_v17  ;;  %v477_v46 = vld [vmem:[#allocation7 + $0x138] sm:$0xff]  ;;  %v476_v47 = vld [vmem:[#allocation7 + $0x130] sm:$0xff]  ;;  %v474_v49 = vld [vmem:[#allocation7 + $0x120] sm:$0xff] }
  0x64   : > { %1160 = vmatpush3.msra.mxu1 %v290_v18  ;;  %1126 = vmatprep.subr.mxu0 %v308_v19  ;;  %v473_v50 = vld [vmem:[#allocation7 + $0x118] sm:$0xff]  ;;  %v472_v51 = vld [vmem:[#allocation7 + $0x110] sm:$0xff]  ;;  %v471_v52 = vld [vmem:[#allocation7 + $0x108] sm:$0xff] }
  0x65   : > { %1161 = vmatprep.subr.mxu1 %v289_v20  ;;  %1127 = vmatpush3.msra.mxu0 %v308_v19  ;;  %v470_v53 = vld [vmem:[#allocation7 + $0x100] sm:$0xff]  ;;  %v612_v55 = vld [vmem:[#allocation9 + $0xf8] sm:$0xff]  ;;  %v611_v57 = vld [vmem:[#allocation9 + $0xf0] sm:$0xff] }
  0x66   : > { %1162 = vmatpush3.msra.mxu1 %v289_v20  ;;  %1128 = vmatprep.subr.mxu0 %v307_v21  ;;  %v468_v54 = vld [vmem:[#allocation2 + $0xa] sm:$0xff]  ;;  %v592_v58 = vld [vmem:[#allocation9 + $0x70] sm:$0xff]  ;;  %v610_v59 = vld [vmem:[#allocation9 + $0xe8] sm:$0xff] }
  0x67   : > { %1163 = vmatprep.subr.mxu1 %v288_v22  ;;  %1129 = vmatpush3.msra.mxu0 %v307_v21  ;;  %v593_v56 = vld [vmem:[#allocation9 + $0x78] sm:$0xff]  ;;  %v591_v60 = vld [vmem:[#allocation9 + $0x68] sm:$0xff]  ;;  %v609_v61 = vld [vmem:[#allocation9 + $0xe0] sm:$0xff] }
  0x68   : > { %1164 = vmatpush3.msra.mxu1 %v288_v22  ;;  %1130 = vmatprep.subr.mxu0 %v306_v23  ;;  %v590_v62 = vld [vmem:[#allocation9 + $0x60] sm:$0xff]  ;;  %v608_v63 = vld [vmem:[#allocation9 + $0xd8] sm:$0xff]  ;;  %v607_v1 = vld [vmem:[#allocation9 + $0xd0] sm:$0xff] }
  0x69   : > { %1165 = vmatprep.subr.mxu1 %v287_v24  ;;  %1131 = vmatpush3.msra.mxu0 %v306_v23  ;;  %v589_v0 = vld [vmem:[#allocation9 + $0x58] sm:$0xff]  ;;  %v588_v2 = vld [vmem:[#allocation9 + $0x50] sm:$0xff]  ;;  %v606_v3 = vld [vmem:[#allocation9 + $0xc8] sm:$0xff] }
  0x6a   : > { %1166 = vmatpush3.msra.mxu1 %v287_v24  ;;  %1132 = vmatprep.subr.mxu0 %v305_v25  ;;  %v587_v4 = vld [vmem:[#allocation9 + $0x48] sm:$0xff]  ;;  %v605_v5 = vld [vmem:[#allocation9 + $0xc0] sm:$0xff]  ;;  %v604_v6 = vld [vmem:[#allocation9 + $0xb8] sm:$0xff] }
  0x6b   : > { %1167 = vmatprep.subr.mxu1 %v286_v26  ;;  %1133 = vmatpush3.msra.mxu0 %v305_v25  ;;  %v603_v7 = vld [vmem:[#allocation9 + $0xb0] sm:$0xff]  ;;  %v602_v8 = vld [vmem:[#allocation9 + $0xa8] sm:$0xff]  ;;  %v601_v9 = vld [vmem:[#allocation9 + $0xa0] sm:$0xff] }
  0x6c   : > { %1168 = vmatpush3.msra.mxu1 %v286_v26  ;;  %1134 = vmatprep.subr.mxu0 %v304_v27  ;;  %v586_v10 = vld [vmem:[#allocation9 + $0x40] sm:$0xff]  ;;  %v600_v11 = vld [vmem:[#allocation9 + $0x98] sm:$0xff]  ;;  %v599_v13 = vld [vmem:[#allocation9 + $0x90] sm:$0xff] }
  0x6d   : > { %1169 = vmatprep.subr.mxu1 %v285_v28  ;;  %1135 = vmatpush3.msra.mxu0 %v304_v27  ;;  %v585_v12 = vld [vmem:[#allocation9 + $0x38] sm:$0xff]  ;;  %v584_v14 = vld [vmem:[#allocation9 + $0x30] sm:$0xff]  ;;  %v598_v17 = vld [vmem:[#allocation9 + $0x88] sm:$0xff] }
  0x6e   : > { %1170 = vmatpush3.msra.mxu1 %v285_v28  ;;  %1136 = vmatprep.subr.mxu0 %v303_v29  ;;  %v583_v18 = vld [vmem:[#allocation9 + $0x28] sm:$0xff]  ;;  %v597_v19 = vld [vmem:[#allocation9 + $0x80] sm:$0xff]  ;;  %v781_v21 = vld [vmem:[#allocation9 + $0x178] sm:$0xff] }
  0x6f   : > { %1171 = vmatprep.subr.mxu1 %v284_v30  ;;  %1137 = vmatpush3.msra.mxu0 %v303_v29  ;;  %v582_v20 = vld [vmem:[#allocation9 + $0x20] sm:$0xff]  ;;  %v581_v22 = vld [vmem:[#allocation9 + $0x18] sm:$0xff]  ;;  %v580_v23 = vld [vmem:[#allocation9 + $0x10] sm:$0xff] }
  0x70   : > { %1172 = vmatpush3.msra.mxu1 %v284_v30  ;;  %1138 = vmatprep.subr.mxu0 %v302_v31  ;;  %v579_v24 = vld [vmem:[#allocation9 + $0x8] sm:$0xff]  ;;  %v578_v25 = vld [vmem:[#allocation9] sm:$0xff] }
  0x71   : > { %1173 = vmatprep.subr.mxu1 %v283_v32  ;;  %1139 = vmatpush3.msra.mxu0 %v302_v31 }
  0x72   : > { %1174 = vmatpush3.msra.mxu1 %v283_v32  ;;  %1140 = vmatprep.subr.mxu0 %v301_v33  ;;  %v993_v32 = vld [vmem:[%s1804_s2] ss:$0 sm:$0xff] }
  0x73   : > { %1175 = vmatprep.subr.mxu1 %v282_v34  ;;  %1141 = vmatpush3.msra.mxu0 %v301_v33 }
  0x74   : > { %1142 = vmatprep.mubr.f32.mxu0 %v1734_v15  ;;  %1176 = vmatpush3.msra.mxu1 %v282_v34 }
  0x75   : > { %1177 = vmatprep.mubr.f32.mxu1 %v280_v35  ;;  %1143 = vmatmul.mubr.f32.vlgmr.msra.gmra.mxu0 %v1738_v16 }
  0x76   : > { %1178 = vmatmul.mubr.f32.vlgmr.msra.gmra.mxu1 %v281_v36  ;;  %1180 = vmatprep.subr.mxu0 %v485_v37 }
  0x77   : > { %1212 = vmatprep.mubr.f32.mxu0 %v467_v38  ;;  %1181 = vmatpush3.msra.mxu0 %v485_v37 }
  0x78   : > { %1182 = vmatprep.subr.mxu0 %v484_v39  ;;  %1215 = vmatprep.subr.mxu1 %v612_v55 }
  0x79   : > { %1183 = vmatpush3.msra.mxu0 %v484_v39  ;;  %1216 = vmatpush3.msra.mxu1 %v612_v55  ;;  %v769_v55 = vld [vmem:[#allocation9 + $0x118] sm:$0xff] }
  0x7a   : > { %1184 = vmatprep.subr.mxu0 %v483_v40  ;;  %1217 = vmatprep.subr.mxu1 %v611_v57 }
  0x7b   : > { %1185 = vmatpush3.msra.mxu0 %v483_v40  ;;  %1218 = vmatpush3.msra.mxu1 %v611_v57  ;;  %v767_v57 = vld [vmem:[#allocation9 + $0x108] sm:$0xff] }
  0x7c   : > { %1186 = vmatprep.subr.mxu0 %v482_v41  ;;  %1219 = vmatprep.subr.mxu1 %v610_v59 }
  0x7d   : > { %1187 = vmatpush3.msra.mxu0 %v482_v41  ;;  %1220 = vmatpush3.msra.mxu1 %v610_v59  ;;  %v780_v41 = vld [vmem:[#allocation9 + $0x170] sm:$0xff] }
  0x7e   : > { %1188 = vmatprep.subr.mxu0 %v481_v42  ;;  %1221 = vmatprep.subr.mxu1 %v609_v61 }
  0x7f   : > { %1189 = vmatpush3.msra.mxu0 %v481_v42  ;;  %1222 = vmatpush3.msra.mxu1 %v609_v61  ;;  %v779_v42 = vld [vmem:[#allocation9 + $0x168] sm:$0xff] }
  0x80   : > { %1190 = vmatprep.subr.mxu0 %v480_v43  ;;  %1223 = vmatprep.subr.mxu1 %v608_v63 }
  0x81   : > { %1191 = vmatpush3.msra.mxu0 %v480_v43  ;;  %1224 = vmatpush3.msra.mxu1 %v608_v63  ;;  %v778_v43 = vld [vmem:[#allocation9 + $0x160] sm:$0xff] }
  0x82   : > { %1192 = vmatprep.subr.mxu0 %v479_v44  ;;  %1225 = vmatprep.subr.mxu1 %v607_v1 }
  0x83   : > { %1193 = vmatpush3.msra.mxu0 %v479_v44  ;;  %1226 = vmatpush3.msra.mxu1 %v607_v1  ;;  %v777_v44 = vld [vmem:[#allocation9 + $0x158] sm:$0xff] }
  0x84   : > { %1194 = vmatprep.subr.mxu0 %v478_v45  ;;  %1227 = vmatprep.subr.mxu1 %v606_v3 }
  0x85   : > { %1195 = vmatpush3.msra.mxu0 %v478_v45  ;;  %1228 = vmatpush3.msra.mxu1 %v606_v3 }
  0x86   : > { %1196 = vmatprep.subr.mxu0 %v477_v46  ;;  %1229 = vmatprep.subr.mxu1 %v605_v5 }
  0x87   : > { %1197 = vmatpush3.msra.mxu0 %v477_v46  ;;  %1230 = vmatpush3.msra.mxu1 %v605_v5 }
  0x88   : > { %1198 = vmatprep.subr.mxu0 %v476_v47  ;;  %1231 = vmatprep.subr.mxu1 %v604_v6 }
  0x89   : > { %1199 = vmatpush3.msra.mxu0 %v476_v47  ;;  %1232 = vmatpush3.msra.mxu1 %v604_v6 }
  0x8a   : > { %1200 = vmatprep.subr.mxu0 %v475_v48  ;;  %1233 = vmatprep.subr.mxu1 %v603_v7 }
  0x8b   : > { %1201 = vmatpush3.msra.mxu0 %v475_v48  ;;  %1234 = vmatpush3.msra.mxu1 %v603_v7  ;;  %v776_v48 = vld [vmem:[#allocation9 + $0x150] sm:$0xff] }
  0x8c   : > { %1202 = vmatprep.subr.mxu0 %v474_v49  ;;  %1235 = vmatprep.subr.mxu1 %v602_v8 }
  0x8d   : > { %1203 = vmatpush3.msra.mxu0 %v474_v49  ;;  %1236 = vmatpush3.msra.mxu1 %v602_v8  ;;  %v775_v49 = vld [vmem:[#allocation9 + $0x148] sm:$0xff] }
  0x8e   : > { %1204 = vmatprep.subr.mxu0 %v473_v50  ;;  %1237 = vmatprep.subr.mxu1 %v601_v9 }
  0x8f   : > { %1205 = vmatpush3.msra.mxu0 %v473_v50  ;;  %1238 = vmatpush3.msra.mxu1 %v601_v9  ;;  %v774_v50 = vld [vmem:[#allocation9 + $0x140] sm:$0xff] }
  0x90   : > { %1206 = vmatprep.subr.mxu0 %v472_v51  ;;  %1239 = vmatprep.subr.mxu1 %v600_v11 }
  0x91   : > { %1207 = vmatpush3.msra.mxu0 %v472_v51  ;;  %1240 = vmatpush3.msra.mxu1 %v600_v11  ;;  %v773_v51 = vld [vmem:[#allocation9 + $0x138] sm:$0xff] }
  0x92   : > { %1208 = vmatprep.subr.mxu0 %v471_v52  ;;  %1241 = vmatprep.subr.mxu1 %v599_v13 }
  0x93   : > { %1209 = vmatpush3.msra.mxu0 %v471_v52  ;;  %1242 = vmatpush3.msra.mxu1 %v599_v13  ;;  %v772_v52 = vld [vmem:[#allocation9 + $0x130] sm:$0xff] }
  0x94   : > { %1210 = vmatprep.subr.mxu0 %v470_v53  ;;  %1243 = vmatprep.subr.mxu1 %v598_v17 }
  0x95   : > { %1211 = vmatpush3.msra.mxu0 %v470_v53  ;;  %1244 = vmatpush3.msra.mxu1 %v598_v17  ;;  %v771_v53 = vld [vmem:[#allocation9 + $0x128] sm:$0xff] }
  0x96   : > { %1213 = vmatmul.mubr.f32.vlgmr.msra.gmra.mxu0 %v468_v54  ;;  %1250 = vmatprep.subr.mxu0 %v593_v56  ;;  %v770_v54 = vld [vmem:[#allocation9 + $0x120] sm:$0xff] }
  0x97   : > { %1251 = vmatpush3.msra.mxu0 %v593_v56  ;;  %1245 = vmatprep.subr.mxu1 %v597_v19  ;;  %v768_v56 = vld [vmem:[#allocation9 + $0x110] sm:$0xff] }
  0x98   : > { %1252 = vmatprep.subr.mxu0 %v592_v58  ;;  %1246 = vmatpush3.msra.mxu1 %v597_v19 }
  0x99   : > { %1253 = vmatpush3.msra.mxu0 %v592_v58  ;;  %1285 = vmatprep.subr.mxu1 %v781_v21  ;;  %v766_v58 = vld [vmem:[#allocation9 + $0x100] sm:$0xff] }
  0x9a   : > { %1254 = vmatprep.subr.mxu0 %v591_v60 }
  0x9b   : > { %1255 = vmatpush3.msra.mxu0 %v591_v60 }
  0x9c   : > { %1256 = vmatprep.subr.mxu0 %v590_v62 }
  0x9d   : > { %1257 = vmatpush3.msra.mxu0 %v590_v62 }
  0x9e   : > { %1258 = vmatprep.subr.mxu0 %v589_v0 }
  0x9f   : > { %1259 = vmatpush3.msra.mxu0 %v589_v0 }
  0xa0   : > { %1260 = vmatprep.subr.mxu0 %v588_v2 }
  0xa1   : > { %1261 = vmatpush3.msra.mxu0 %v588_v2  ;;  %v994_v2 = vld [vmem:[%s1806_s4] ss:$0 sm:$0xff] }
  0xa2   : > { %1262 = vmatprep.subr.mxu0 %v587_v4 }
  0xa3   : > { %1263 = vmatpush3.msra.mxu0 %v587_v4 }
  0xa4   : > { %1264 = vmatprep.subr.mxu0 %v586_v10 }
  0xa5   : > { %1265 = vmatpush3.msra.mxu0 %v586_v10 }
  0xa6   : > { %1266 = vmatprep.subr.mxu0 %v585_v12 }
  0xa7   : > { %1267 = vmatpush3.msra.mxu0 %v585_v12 }
  0xa8   : > { %1268 = vmatprep.subr.mxu0 %v584_v14 }
  0xa9   : > { %1269 = vmatpush3.msra.mxu0 %v584_v14 }
  0xaa   : > { %1270 = vmatprep.subr.mxu0 %v583_v18 }
  0xab   : > { %1271 = vmatpush3.msra.mxu0 %v583_v18 }
  0xac   : > { %1272 = vmatprep.subr.mxu0 %v582_v20 }
  0xad   : > { %1273 = vmatpush3.msra.mxu0 %v582_v20 }
  0xae   : > { %1274 = vmatprep.subr.mxu0 %v581_v22 }
  0xaf   : > { %1275 = vmatpush3.msra.mxu0 %v581_v22 }
  0xb0   : > { %1276 = vmatprep.subr.mxu0 %v580_v23 }
  0xb1   : > { %1277 = vmatpush3.msra.mxu0 %v580_v23 }
  0xb2   : > { %1278 = vmatprep.subr.mxu0 %v579_v24 }
  0xb3   : > { %1279 = vmatpush3.msra.mxu0 %v579_v24 }
  0xb4   : > { %1280 = vmatprep.subr.mxu0 %v578_v25 }
  0xb5   : > { %1281 = vmatpush3.msra.mxu0 %v578_v25 }
 0x135   : > { %v1144_v26 = vpop.f32.mrf.mxu0 }
 0x136   : > { %v1179_v27 = vpop.f32.mrf.mxu1 }
 0x137   : > { %v383_v28 = vpop.f32.mrf.mxu0  ;;  %v464_v30 = vadd.f32 %v1179_v27, %v1144_v26 }
 0x138   : > { %v458_v29 = vpop.f32.mrf.mxu1 }
 0x139   : > { %v459_v33 = vadd.f32 %v458_v29, %v383_v28 }
 0x156   : > { %v1214_v31 = vpop.f32.mrf.mxu0 }
 0x157   : > { %v562_v34 = vadd.f32 %v1214_v31, %v464_v30 }
 0x158   : > { %v552_v35 = vpop.f32.mrf.mxu0 }
 0x159   : > { %v571_v36 = vadd.f32 %v993_v32, %v562_v34  ;;  %v561_v37 = vadd.f32 %v552_v35, %v459_v33 }
 0x15b   : > { %v573_v38 = vmax.f32 %v571_v36, 0.0  ;;  %v570_v39 = vadd.f32 %v993_v32, %v561_v37 }
 0x15d   : > { %575 = vst [vmem:[#allocation3 + $0x9] sm:$0xff] %v573_v38  ;;  %v572_v40 = vmax.f32 %v570_v39, 0.0 }
 0x15f   : > { %574 = vst [vmem:[#allocation3 + $0x1] sm:$0xff] %v572_v40  ;;  %1247 = vmatprep.mubr.f32.mxu1 %v572_v40 }
 0x160   : > { %1248 = vmatmul.mubr.f32.vlgmr.msra.gmra.mxu1 %v573_v38 }
 0x161   : > { %1286 = vmatpush3.msra.mxu1 %v781_v21 }
 0x162   : > { %1287 = vmatprep.subr.mxu1 %v780_v41 }
 0x163   : > { %1288 = vmatpush3.msra.mxu1 %v780_v41 }
 0x164   : > { %1289 = vmatprep.subr.mxu1 %v779_v42  ;;  %v764_v59 = vld [vmem:[#allocation3 + $0xa] sm:$0xff] }
 0x165   : > { %1290 = vmatpush3.msra.mxu1 %v779_v42 }
 0x166   : > { %v576_v45 = vld [vmem:[#allocation3] sm:$0xff]  ;;  %v577_v46 = vld [vmem:[#allocation3 + $0x8] sm:$0xff]  ;;  %1291 = vmatprep.subr.mxu1 %v778_v43 }
 0x167   : > { %v763_v47 = vld [vmem:[#allocation3 + $0x2] sm:$0xff]  ;;  %1282 = vmatprep.mubr.f32.mxu0 %v576_v45  ;;  %1292 = vmatpush3.msra.mxu1 %v778_v43 }
 0x168   : > { %1317 = vmatprep.mubr.f32.mxu1 %v763_v47  ;;  %1283 = vmatmul.mubr.f32.vlgmr.msra.gmra.mxu0 %v577_v46 }
 0x169   : > { %1293 = vmatprep.subr.mxu1 %v777_v44 }
 0x16a   : > { %1294 = vmatpush3.msra.mxu1 %v777_v44 }
 0x16b   : > { %1295 = vmatprep.subr.mxu1 %v776_v48 }
 0x16c   : > { %1296 = vmatpush3.msra.mxu1 %v776_v48 }
 0x16d   : > { %1297 = vmatprep.subr.mxu1 %v775_v49 }
 0x16e   : > { %1298 = vmatpush3.msra.mxu1 %v775_v49 }
 0x16f   : > { %1299 = vmatprep.subr.mxu1 %v774_v50 }
 0x170   : > { %1300 = vmatpush3.msra.mxu1 %v774_v50 }
 0x171   : > { %1301 = vmatprep.subr.mxu1 %v773_v51 }
 0x172   : > { %1302 = vmatpush3.msra.mxu1 %v773_v51 }
 0x173   : > { %1303 = vmatprep.subr.mxu1 %v772_v52 }
 0x174   : > { %1304 = vmatpush3.msra.mxu1 %v772_v52 }
 0x175   : > { %1305 = vmatprep.subr.mxu1 %v771_v53 }
 0x176   : > { %1306 = vmatpush3.msra.mxu1 %v771_v53 }
 0x177   : > { %1307 = vmatprep.subr.mxu1 %v770_v54 }
 0x178   : > { %1308 = vmatpush3.msra.mxu1 %v770_v54 }
 0x179   : > { %1309 = vmatprep.subr.mxu1 %v769_v55 }
 0x17a   : > { %1310 = vmatpush3.msra.mxu1 %v769_v55 }
 0x17b   : > { %1311 = vmatprep.subr.mxu1 %v768_v56 }
 0x17c   : > { %1312 = vmatpush3.msra.mxu1 %v768_v56 }
 0x17d   : > { %1313 = vmatprep.subr.mxu1 %v767_v57 }
 0x17e   : > { %1314 = vmatpush3.msra.mxu1 %v767_v57 }
 0x17f   : > { %1315 = vmatprep.subr.mxu1 %v766_v58 }
 0x180   : > { %1316 = vmatpush3.msra.mxu1 %v766_v58 }
 0x181   : > { %1318 = vmatmul.mubr.f32.vlgmr.msra.gmra.mxu1 %v764_v59 }
 0x220   : > { %v1249_v60 = vpop.f32.mrf.mxu1 }
 0x222   : > { %v679_v62 = vpop.f32.mrf.mxu1 }
 0x228   : > { %v1284_v61 = vpop.f32.mrf.mxu0 }
 0x229   : > { %v760_v0 = vadd.f32 %v1284_v61, %v1249_v60 }
 0x22a   : > { %v754_v63 = vpop.f32.mrf.mxu0 }
 0x22b   : > { %v755_v3 = vadd.f32 %v754_v63, %v679_v62 }
 0x241   : > { %v1319_v1 = vpop.f32.mrf.mxu1 }
 0x242   : > { %v858_v4 = vadd.f32 %v1319_v1, %v760_v0 }
 0x243   : > { %v848_v5 = vpop.f32.mrf.mxu1 }
 0x244   : > { %v867_v6 = vadd.f32 %v994_v2, %v858_v4  ;;  %v857_v7 = vadd.f32 %v848_v5, %v755_v3 }
 0x246   : > { %v869_v8 = vadd.f32 %v867_v6, %v1738_v16  ;;  %v866_v9 = vadd.f32 %v994_v2, %v857_v7 }
 0x248   : > { %v871_v10 = vmax.f32 %v869_v8, 0.0  ;;  %v868_v11 = vadd.f32 %v866_v9, %v1734_v15 }
 0x24a   : > { %873 = vst [vmem:[%s271_s12 + $0x8] sm:$0xff] %v871_v10  ;;  %v870_v12 = vmax.f32 %v868_v11, 0.0 }
 0x24c   : > { %872 = vst [vmem:[%s271_s12] sm:$0xff] %v870_v12 }
 0x24d   : > { %1485 = shalt.err (!%p1482_p3)
}
 0x24e   : > { %s1486_s13 = scalar_lea.hbm %s1759_s11, 256  ;;  %s1490_s9 = scalar_lea.hbm %s1807_s5, 512 }
 0x24f   : > { %p1487_p11 = scmp.ne.s32.totalorder %s1759_s11, %s1486_s13  ;;  %p1491_p4 = scmp.lt.s32.totalorder %s1759_s11, %s1807_s5 }
 0x250   : > { %p1492_p6 = scmp.lt.s32.totalorder %s1490_s9, %s1486_s13 }
 0x251   : > { %p1488_p9 = pnand %p1487_p11, %p1824_p2 }
 0x252   : > { %p1493_p8 = por %p1492_p6, %p1491_p4 }
 0x253   : > { %p1489_p1 = pneg %p1488_p9 }
 0x255   : > { %p1494_p5 = pnand %p1493_p8, %p1489_p1 }
 0x257   : > { %1497 = shalt.err (!%p1494_p5)
}
 0x258   : > { %s1549_s6 = smov 128   ;;  %s1550_s7 = smov 8  }
 0x259   : > { %1330 = dma.vmem_to_hbm [thread:$0]  (%p1824_p2), %s1753_s14, 256, %s1759_s11, %s875_s17, %s1549_s6, %s1549_s6, %s1550_s7  }
 0x25a PF: > { %s903_s28 = sand.u32 1, %s1528_s18   ;;  %p1825_p7 = scmp.ne.s32.totalorder %s1814_s25, 0 }
 0x25b   : > { %p1826_p12 = scmp.ge.s32.totalorder %s1540_s21, 2  ;;  %s904_s16 = scalar_lea.sflag [#allocation6], %s903_s28 }
 0x25d   : > { %p1344_p13 = pnand %p1826_p12, %p1825_p7 }
 0x25f   : > { %p1345_p0 = pneg %p1344_p13 }
 0x261   : > { %1523 = dma.done.wait (%p1345_p0), %s904_s16, 256  }
 0x262   : > { %1525 = vsyncadd (%p1345_p0), %s904_s16, 4294967040  ;;  %p19_p10 = scmp.ge.s32.totalorder %s1659_s15, 4   ;;  %s1827_s18 = smov %s1532_s19 }
 0x263   : > { %s1828_s19 = smov %s1536_s20  ;;  %s1829_s20 = smov %s1675_s27 }
 0x264   : > { %s1830_s21 = smov %s1659_s15  ;;  %21 = sbr.rel (!%p19_p10) target bundleno = 6 (0x6), region = 97 }
 0x269   :  { %909 = vsyncpa [#allocation5], 1 }
 0x26a   :  { %911 = vsyncpa [#allocation5 + $0x1], 1 }
 0x26b   :  { %912 = vsyncpa [#allocation8], 1 }
 0x26c   :  { %913 = vsyncpa [#allocation6], 1 }
 0x26d   :  { %915 = vsyncpa [#allocation6 + $0x1], 1 }

</bundles_post_ra>
